<compile_context>
chip_gen: v5e
topology: v5e:2x2
jax: 0.10.0
libtpu: 0.0.40
codegen_flags: <defaults>
</compile_context>

<pallas_src>
import functools

import jax
import jax.numpy as jnp
from jax import lax
from jax.experimental import pallas as pl
from jax.experimental.pallas import tpu as pltpu


def _round_up(x, m):
    return ((x + m - 1) // m) * m


def _pad_lanes(n):
    """Lane (last-dim) padding target: multiples of the preferred 512-wide tile
    for big dims (so tn never silently degrades), 128-multiples for small dims."""
    return _round_up(n, 512) if n >= 512 else _round_up(n, 128)


def _pick_tn(n_p):
    for t in (512, 256, 128):
        if n_p % t == 0:
            return t
    return n_p


# ---------------------------------------------------------------------------
# Weight-stationary tiled matmul + bias:  out = a @ b + bias   (f32 accum)
# Used for (a) the hoisted x @ W_ih^T precompute and (b) the vocab projection.
# ---------------------------------------------------------------------------
def _matmul_bias_kernel(a_ref, b_ref, bias_ref, o_ref):
    o_ref[...] = (jnp.dot(a_ref[...], b_ref[...],
                          preferred_element_type=jnp.float32)
                  + bias_ref[...]).astype(o_ref.dtype)


def matmul_bias_pallas(a, b, bias, out_dtype=jnp.float32):
    """a: (M, K) bf16, b: (K, N_p) bf16 pre-padded/pre-transposed,
    bias: (1, N_p) f32.  Returns (M, N_p) in out_dtype (lane padding kept so the
    caller can slice/fuse the unpad lazily)."""
    M, K = a.shape
    Kb, N_p = b.shape
    assert K == Kb

    tn = _pick_tn(N_p)

    # Sublane (M) padding: full-M tile when modest (weight streamed exactly
    # once), otherwise 256-row tiles (full MXU occupancy on v6e/v7x).
    if M <= 1024:
        M_p = _round_up(M, 8)
        tm = M_p
    else:
        M_p = _round_up(M, 256)
        tm = 256
    if M_p != M:
        a = jnp.pad(a, ((0, M_p - M), (0, 0)))

    out = pl.pallas_call(
        _matmul_bias_kernel,
        out_shape=jax.ShapeDtypeStruct((M_p, N_p), out_dtype),
        grid_spec=pltpu.PrefetchScalarGridSpec(
            num_scalar_prefetch=0,
            # N outer, M inner -> the (K, tn) weight block index is constant
            # across the inner axis, so each weight tile is fetched once.
            grid=(N_p // tn, M_p // tm),
            in_specs=[
                pl.BlockSpec((tm, K), lambda n, m: (m, 0)),   # activation rows
                pl.BlockSpec((K, tn), lambda n, m: (0, n)),   # weight tile (stationary in m)
                pl.BlockSpec((1, tn), lambda n, m: (0, n)),   # bias tile
            ],
            out_specs=pl.BlockSpec((tm, tn), lambda n, m: (m, n)),
        ),
        compiler_params=pltpu.CompilerParams(
            dimension_semantics=("parallel", "parallel"),
            # Portable cap: well under v7x's 64 MiB physical VMEM, above the
            # 16 MiB v5e scoped default so larger tiles still pipeline.
            vmem_limit_bytes=48 * 1024 * 1024),
    )(a, b, bias)
    return out[:M] if M_p != M else out


# ---------------------------------------------------------------------------
# Recurrent Pallas kernel: U LSTM time steps per grid iteration, batch-first.
# Inputs are the precomputed gate preactivations (x @ W_ih^T + b).
# Only the small h @ W_hh^T matmul remains inside the serial loop.
# ---------------------------------------------------------------------------
def _lstm_recurrence_kernel(g_ref, w_hh_ref, h_out_ref, h_scr, c_scr, *, U, H):
    @pl.when(pl.program_id(1) == 0)          # new batch block -> reset state
    def _init():
        h_scr[...] = jnp.zeros_like(h_scr)
        c_scr[...] = jnp.zeros_like(c_scr)

    w_hh = w_hh_ref[...]          # (H, 4H) bf16, pre-transposed
    h = h_scr[...]                # (BB, H) f32
    c = c_scr[...]                # (BB, H) f32

    for u in range(U):            # static unroll over the time chunk
        gates = g_ref[:, u, :] + jnp.dot(h.astype(w_hh.dtype), w_hh,
                                         preferred_element_type=jnp.float32)
        # PyTorch gate order: input, forget, cell (g), output
        i_g = jax.nn.sigmoid(gates[:, 0 * H:1 * H])
        f_g = jax.nn.sigmoid(gates[:, 1 * H:2 * H])
        g_g = jnp.tanh(gates[:, 2 * H:3 * H])
        o_g = jax.nn.sigmoid(gates[:, 3 * H:4 * H])
        c = f_g * c + i_g * g_g
        h = o_g * jnp.tanh(c)
        h_out_ref[:, u, :] = h.astype(h_out_ref.dtype)

    h_scr[...] = h
    c_scr[...] = c


def lstm_recurrence_pallas(gates_bt4h, w_hh_t, unroll=16):
    """gates_bt4h: (B, T, 4H) f32 batch-first, w_hh_t: (H, 4H) bf16
    -> h: (B, T, H) bf16 batch-first."""
    B, T, G = gates_bt4h.shape
    H = w_hh_t.shape[0]

    U = unroll
    T_p = _round_up(T, U)          # pad time so U=16 always usable
    B_p = _round_up(B, 8)          # sublane-dense state / dense vregs
    pad_t, pad_b = T_p - T, B_p - B
    if pad_t or pad_b:
        gates_bt4h = jnp.pad(gates_bt4h, ((0, pad_b), (0, pad_t), (0, 0)))

    NB = 2 if B_p % 16 == 0 else 1  # batch split across v7x's two TensorCores
    BB = B_p // NB

    kernel = functools.partial(_lstm_recurrence_kernel, U=U, H=H)
    h = pl.pallas_call(
        kernel,
        out_shape=jax.ShapeDtypeStruct((B_p, T_p, H), jnp.bfloat16),
        grid_spec=pltpu.PrefetchScalarGridSpec(
            num_scalar_prefetch=0,
            grid=(NB, T_p // U),
            in_specs=[
                pl.BlockSpec((BB, U, G), lambda b, i: (b, i, 0)),  # gate preacts
                pl.BlockSpec((H, G), lambda b, i: (0, 0)),         # W_hh^T (small)
            ],
            out_specs=pl.BlockSpec((BB, U, H), lambda b, i: (b, i, 0)),
            scratch_shapes=[
                pltpu.VMEM((BB, H), jnp.float32),   # h state (per-core)
                pltpu.VMEM((BB, H), jnp.float32),   # c state (per-core)
            ],
        ),
        compiler_params=pltpu.CompilerParams(
            dimension_semantics=("parallel", "arbitrary")),  # batch || , time serial
    )(gates_bt4h, w_hh_t)
    return h[:B, :T] if (pad_t or pad_b) else h


# ---------------------------------------------------------------------------
# One-time weight preprocessing (hoisted OUT of the per-call forward path).
# ---------------------------------------------------------------------------
def prepare_params(params):
    H = params["w_hh"].shape[1]
    V = params["wl"].shape[0]
    G = 4 * H

    # Gate weights: contraction dim on sublanes, bf16.
    w_ih_t = params["w_ih"].T.astype(jnp.bfloat16)                  # (E, 4H)
    b_gates = (params["b_ih"] + params["b_hh"]).reshape(1, G).astype(jnp.float32)
    G_p = _pad_lanes(G)
    if G_p != G:
        w_ih_t = jnp.pad(w_ih_t, ((0, 0), (0, G_p - G)))
        b_gates = jnp.pad(b_gates, ((0, 0), (0, G_p - G)))

    # Vocab projection weight: pre-transposed, bf16, lane-padded to a 512-tile
    # multiple (e.g. 30522 -> 30720) so tn stays at the preferred size.
    wl_t = params["wl"].T.astype(jnp.bfloat16)                      # (H, V)
    bl = params["bl"].reshape(1, V).astype(jnp.float32)
    V_p = _pad_lanes(V)
    if V_p != V:
        wl_t = jnp.pad(wl_t, ((0, 0), (0, V_p - V)))
        bl = jnp.pad(bl, ((0, 0), (0, V_p - V)))

    return {
        "embed_w": params["embed_w"],
        "w_ih_t": w_ih_t,
        "w_hh_t": params["w_hh"].T.astype(jnp.bfloat16),            # (H, 4H)
        "b_gates": b_gates,
        "wl_t": wl_t,
        "bl": bl,
    }


# ---------------------------------------------------------------------------
# DecoderRNN forward (embedding gather in JAX, everything heavy in Pallas)
# ---------------------------------------------------------------------------
def decoder_rnn_forward(prepped, features, captions, vocab_size):
    """features: (B, E) f32, captions: (B, L) int32 -> logits (B, L, V) bf16."""
    emb = prepped["embed_w"][captions[:, :-1]]                      # (B, L-1, E)
    # TODO(synk): nn.Dropout(0.2) is stochastic in training; modeled as identity
    # (eval mode) here.
    inputs = jnp.concatenate([features[:, None, :], emb], 1)        # (B, T, E)
    B, T, E = inputs.shape
    H = prepped["w_hh_t"].shape[0]

    # (1) Input-side gate preactivations for all (b, t) rows at once.
    gates = matmul_bias_pallas(inputs.reshape(B * T, E).astype(jnp.bfloat16),
                               prepped["w_ih_t"], prepped["b_gates"],
                               out_dtype=jnp.float32)               # (B*T, G_p)
    if gates.shape[1] != 4 * H:
        gates = gates[:, :4 * H]
    gates = gates.reshape(B, T, 4 * H)

    # (2) Sequential recurrence (only h @ W_hh^T per step), batch-first output.
    h_bth = lstm_recurrence_pallas(gates, prepped["w_hh_t"])        # (B, T, H) bf16

    # (3) Weight-stationary vocab projection, bf16 logits, padded lanes kept
    #     until this single final slice (a downstream loss could fuse it away).
    logits = matmul_bias_pallas(h_bth.reshape(B * T, H),
                                prepped["wl_t"], prepped["bl"],
                                out_dtype=jnp.bfloat16)             # (B*T, V_p)
    if logits.shape[1] != vocab_size:
        logits = logits[:, :vocab_size]
    return logits.reshape(B, T, vocab_size)


# ---------------------------------------------------------------------------
# Pure-JAX f32 reference (for correctness checking)
# ---------------------------------------------------------------------------
def decoder_rnn_reference(params, features, captions):
    emb = params["embed_w"][captions[:, :-1]]
    inputs = jnp.concatenate([features[:, None, :], emb], 1)        # (B, T, E)
    B, T, E = inputs.shape
    H = params["w_hh"].shape[1]
    b = params["b_ih"] + params["b_hh"]

    def step(carry, x_t):
        h, c = carry
        gates = x_t @ params["w_ih"].T + h @ params["w_hh"].T + b
        i_g = jax.nn.sigmoid(gates[:, 0 * H:1 * H])
        f_g = jax.nn.sigmoid(gates[:, 1 * H:2 * H])
        g_g = jnp.tanh(gates[:, 2 * H:3 * H])
        o_g = jax.nn.sigmoid(gates[:, 3 * H:4 * H])
        c_new = f_g * c + i_g * g_g
        h_new = o_g * jnp.tanh(c_new)
        return (h_new, c_new), h_new

    h0 = jnp.zeros((B, H), jnp.float32)
    c0 = jnp.zeros((B, H), jnp.float32)
    _, hs = lax.scan(step, (h0, c0), jnp.transpose(inputs, (1, 0, 2)))
    hs = jnp.transpose(hs, (1, 0, 2))                                # (B, T, H)
    return hs @ params["wl"].T + params["bl"]


# ---------------------------------------------------------------------------
# Deterministic parameter init + demo
# ---------------------------------------------------------------------------
def make_params(key, vocab_size, embed_size, hidden_size):
    ks = jax.random.split(key, 7)
    s = 0.1
    return {
        "embed_w": s * jax.random.normal(ks[0], (vocab_size, embed_size), jnp.float32),
        "w_ih":    s * jax.random.normal(ks[1], (4 * hidden_size, embed_size), jnp.float32),
        "w_hh":    s * jax.random.normal(ks[2], (4 * hidden_size, hidden_size), jnp.float32),
        "b_ih":    s * jax.random.normal(ks[3], (4 * hidden_size,), jnp.float32),
        "b_hh":    s * jax.random.normal(ks[4], (4 * hidden_size,), jnp.float32),
        "wl":      s * jax.random.normal(ks[5], (vocab_size, hidden_size), jnp.float32),
        "bl":      s * jax.random.normal(ks[6], (vocab_size,), jnp.float32),
    }


if __name__ == "__main__":
    # Small synthetic shapes (real module: embed=256, hidden=512, vocab~30k;
    # scaled down here — production shapes satisfy the H%128 / B%8 alignment).
    B, L = 2, 16           # batch, caption length  -> LSTM seq len T = L
    E, H, V = 32, 32, 128  # embed_size, hidden_size, vocab_size

    key = jax.random.PRNGKey(0)
    k_p, k_f, k_c = jax.random.split(key, 3)

    params = make_params(k_p, V, E, H)
    features = jax.random.normal(k_f, (B, E), jnp.float32)
    captions = jax.random.randint(k_c, (B, L), 0, V, dtype=jnp.int32)

    prepped = prepare_params(params)   # one-time transpose/cast/pad, hoisted

    out = jax.block_until_ready(decoder_rnn_forward(prepped, features, captions, V))
    assert out.shape == (B, L, V), out.shape

    ref = jax.block_until_ready(decoder_rnn_reference(params, features, captions))
    err = float(jnp.max(jnp.abs(out.astype(jnp.float32) - ref)))
    # bf16 matmul operands + bf16 logits with f32 accumulation -> loosened tol.
    assert err < 3e-2, err

    print("KERNEL_OK")
</pallas_src>

<mosaic_0001>
module attributes {stable_mosaic.version = 11 : i64} {
  func.func @_matmul_bias_kernel(%arg0: i32, %arg1: i32, %arg2: memref<32x32xbf16, #tpu.memory_space<vmem>>, %arg3: memref<32x128xbf16, #tpu.memory_space<vmem>>, %arg4: memref<1x128xf32, #tpu.memory_space<vmem>>, %arg5: memref<32x128xf32, #tpu.memory_space<vmem>>) attributes {dimension_semantics = [#tpu.dimension_semantics<parallel>, #tpu.dimension_semantics<parallel>], iteration_bounds = array<i64: 1, 1>, scalar_prefetch = 0 : i64, scratch_operands = 0 : i64, tpu.core_type = #tpu.core_type<tc>, window_params = [{transform_indices = @transform_0, window_bounds = array<i64: 32, 32>}, {transform_indices = @transform_1, window_bounds = array<i64: 32, 128>}, {transform_indices = @transform_2, window_bounds = array<i64: 1, 128>}, {transform_indices = @transform_3, window_bounds = array<i64: 32, 128>}]} {
    %c0 = arith.constant 0 : index
    %c0_0 = arith.constant 0 : index
    %0 = vector.load %arg2[%c0, %c0_0] : memref<32x32xbf16, #tpu.memory_space<vmem>>, vector<32x32xbf16>
    %c0_1 = arith.constant 0 : index
    %c0_2 = arith.constant 0 : index
    %1 = vector.load %arg3[%c0_1, %c0_2] : memref<32x128xbf16, #tpu.memory_space<vmem>>, vector<32x128xbf16>
    %cst = arith.constant dense<0.000000e+00> : vector<32x128xf32>
    %2 = tpu.matmul %0, %1, %cst {dimension_numbers = #tpu.dot_dimension_numbers<[1], [0], [0], [1], [0, 0, 1, 1], [], []>} : vector<32x32xbf16>, vector<32x128xbf16>, vector<32x128xf32> -> vector<32x128xf32>
    %c0_3 = arith.constant 0 : index
    %c0_4 = arith.constant 0 : index
    %3 = vector.load %arg4[%c0_3, %c0_4] : memref<1x128xf32, #tpu.memory_space<vmem>>, vector<1x128xf32>
    %4 = vector.broadcast %3 : vector<1x128xf32> to vector<32x128xf32>
    %5 = arith.addf %2, %4 : vector<32x128xf32>
    %c0_5 = arith.constant 0 : index
    %c0_6 = arith.constant 0 : index
    %6 = vector.load %arg5[%c0_5, %c0_6] : memref<32x128xf32, #tpu.memory_space<vmem>>, vector<32x128xf32>
    tpu.vector_store %arg5[%c0_5, %c0_6], %5 {strides = array<i32>} : memref<32x128xf32, #tpu.memory_space<vmem>>, vector<32x128xf32>,
    return
  }
  func.func @transform_0(%arg0: i32, %arg1: i32) -> (i32, i32) {
    %c0_i32 = arith.constant 0 : i32
    %c0_i32_0 = arith.constant 0 : i32
    return %arg1, %c0_i32 : i32, i32
  }
  func.func @transform_1(%arg0: i32, %arg1: i32) -> (i32, i32) {
    %c0_i32 = arith.constant 0 : i32
    %c0_i32_0 = arith.constant 0 : i32
    return %c0_i32, %arg0 : i32, i32
  }
  func.func @transform_2(%arg0: i32, %arg1: i32) -> (i32, i32) {
    %c0_i32 = arith.constant 0 : i32
    %c0_i32_0 = arith.constant 0 : i32
    return %c0_i32, %arg0 : i32, i32
  }
  func.func @transform_3(%arg0: i32, %arg1: i32) -> (i32, i32) {
    %c0_i32 = arith.constant 0 : i32
    return %arg1, %arg0 : i32, i32
  }
}

</mosaic_0001>

<bundles_post_ra>
// kernel: tpu_custom_call.1
= control target key start
LH: loop header
LB: loop body
LE: loop exit
PB: predicated region body
PF: predicated region fallthrough
CT: control target
= control target key end

     0   :  { %8 = vsyncpa [#allocation3], 0  ;;  %s281_s0 = inlined_call_operand.hbm [shape: bf16[32,32], index: 0, kind: input, shape index: {}]   ;;  %s282_s1 = inlined_call_operand.hbm [shape: bf16[32,128], index: 1, kind: input, shape index: {}]   ;;  %s283_s2 = inlined_call_operand.vmem [shape: f32[1,128], index: 2, kind: input, shape index: {}]   ;;  %s284_s3 = inlined_call_operand.hbm [shape: f32[32,128], index: 3, kind: output, shape index: {}]  }
   0x1   :  { %9 = vsyncpa [#allocation6], 0 }
   0x2   :  { %10 = vsyncpa [#allocation4], 0  ;;  %s15_s14 = sshll.u32 %s281_s0, 4  ;;  %s242_s15 = smov [#allocation2]   ;;  %s16_s14 = int_to_ptr.hbm [resolvable:$true] %s15_s14 }
   0x3   :  { %s17_s16 = sshll.u32 %s242_s15, 4  ;;  %s28_s19 = sshll.u32 %s282_s1, 4  ;;  %s18_s16 = int_to_ptr.vmem [resolvable:$true] %s17_s16  ;;  %s29_s19 = int_to_ptr.hbm [resolvable:$true] %s28_s19 }
   0x4   :  { %s243_s20 = smov 64   ;;  %s244_s21 = smov 4  }
   0x5   :  { %23 = dma.hbm_to_vmem [thread:$0]  %s16_s14, 256, %s18_s16, [#allocation3], %s243_s20, %s243_s20, %s244_s21  }
   0x6   :  { %s245_s22 = smov [#allocation5]  }
   0x7   :  { %s30_s23 = sshll.u32 %s245_s22, 4  ;;  %s31_s23 = int_to_ptr.vmem [resolvable:$true] %s30_s23 }
   0x8   :  { %36 = dma.hbm_to_vmem [thread:$0]  %s29_s19, 256, %s31_s23, [#allocation6], %s243_s20, %s243_s20, %s244_s21  }
   0x9   :  { %236 = dma.done.wait [#allocation3], 256  }
   0xa   :  { %237 = vsyncadd [#allocation3], 4294967040 }
   0xb   :  { %238 = dma.done.wait [#allocation6], 256  }
   0xc   :  { %239 = vsyncadd [#allocation6], 4294967040  ;;  %v153_v0 = vld [vmem:[#allocation5 + $0x8] sm:$0xff]  ;;  %v152_v1 = vld [vmem:[#allocation5] sm:$0xff]  ;;  %vm82_vm0 = vcmask 261120   ;;  %s246_s24 = smov [#allocation7]  }
   0xd   :  { %95 = vmatpush.bf16.msra.mxu0 %v153_v0  ;;  %154 = vmatpush.bf16.msra.mxu1 %v153_v0  ;;  %v150_v2 = vld [vmem:[#allocation2] sm:$0xff]  ;;  %v151_v3 = vld [vmem:[#allocation2 + $0x8] sm:$0xff]  ;;  %s116_s25 = sshll.u32 %s246_s24, 4  ;;  %s118_s28 = sshll.u32 %s284_s3, 4  ;;  %s117_s25 = int_to_ptr.vmem [resolvable:$true] %s116_s25  ;;  %s119_s28 = int_to_ptr.hbm [resolvable:$true] %s118_s28 }
   0xe   :  { %v163_v4 = vld [vmem:[%s283_s2] ss:$0 sm:$0xff]  ;;  %s247_s2 = smov 128   ;;  %s248_s29 = smov 8  }
  0x11   :  { %96 = vmatpush.bf16.msra.mxu0 %v152_v1  ;;  %155 = vmatpush.bf16.msra.mxu1 %v152_v1 }
  0x14   :  { %148 = vmatmul.msk.bf16.vlgmr.msra.gmra.mxu0 %vm82_vm0, %v150_v2  ;;  %149 = vmatmul.msk.bf16.vlgmr.msra.gmra.mxu1 %vm82_vm0, %v151_v3 }
  0x91   :  { %v98_v5 = vpop.f32.mrf.mxu0  ;;  %v103_v6 = vpop.f32.mrf.mxu1 }
  0x92   :  { %v99_v7 = vadd.f32 %v163_v4, %v98_v5  ;;  %v104_v8 = vadd.f32 %v163_v4, %v103_v6 }
  0x94   :  { %108 = vst [vmem:[#allocation7] sm:$0xff] %v99_v7 }
  0x95   :  { %110 = vst [vmem:[#allocation7 + $0x10] sm:$0xff] %v104_v8 }
  0x99   :  { %v100_v9 = vpop.f32.mrf.mxu0  ;;  %v105_v10 = vpop.f32.mrf.mxu1 }
  0x9a   :  { %v101_v11 = vadd.f32 %v163_v4, %v100_v9  ;;  %v106_v12 = vadd.f32 %v163_v4, %v105_v10 }
  0x9c   :  { %109 = vst [vmem:[#allocation7 + $0x8] sm:$0xff] %v101_v11 }
  0x9d   :  { %111 = vst [vmem:[#allocation7 + $0x18] sm:$0xff] %v106_v12 }
  0x9e   :  { %124 = dma.vmem_to_hbm [thread:$0]  %s117_s25, 512, %s119_s28, [#allocation4], %s247_s2, %s247_s2, %s248_s29  }
  0x9f   :  { %240 = dma.done.wait [#allocation4], 512  }
  0xa0   :  { %241 = vsyncadd [#allocation4], 4294966784 }
  0xa1   :  { %129 = vsyncpa [#allocation3], 1 }
  0xa2   :  { %130 = vsyncpa [#allocation6], 1 }
  0xa3   :  { %131 = vsyncpa [#allocation4], 1 }

</bundles_post_ra>
